<compile_context>
chip_gen: v7x
topology: tpu7x:2x2x1
jax: 0.10.0
libtpu: 0.0.40
codegen_flags: <defaults>
</compile_context>

<pallas_src>
import functools

import jax
import jax.numpy as jnp
from jax.experimental import pallas as pl
from jax.experimental.pallas import tpu as pltpu


_TARGET_TILE_BYTES = 2 * 1024 * 1024   # ~2 MiB per VMEM tile (in OR out)
_VMEM_LIMIT_BYTES = 32 * 1024 * 1024   # explicit scoped-VMEM headroom


def _solarize_kernel(sel_ref, x_ref, o_ref):
    # sel_ref: VMEM int32[B, 1] per-batch selection flags.
    # x_ref / o_ref: VMEM (B, block_cols) tile of the flattened images.
    x = x_ref[...]
    half = jnp.asarray(0.5, dtype=x.dtype)
    one = jnp.asarray(1.0, dtype=x.dtype)
    solarized = jnp.where(x < half, x, one - x)
    is_sel = sel_ref[...] != 0                      # (B, 1) bool, broadcasts over lanes
    o_ref[...] = jnp.where(is_sel, solarized, x)


def _choose_block_cols(batch, chw, itemsize):
    """Lane width of one tile, targeting ~_TARGET_TILE_BYTES of VMEM."""
    rows_padded = ((batch + 7) // 8) * 8            # sublane padding for small B
    cols = _TARGET_TILE_BYTES // (rows_padded * itemsize)
    cols = max(128, (cols // 128) * 128)            # lane-dense: multiple of 128
    if cols >= chw:
        # Whole row fits in one tile: use the exact row length (block dim equals
        # the full array dim, so any C*H*W is legal without padding).
        return chw
    return cols


@functools.partial(
    jax.jit, static_argnames=("p", "return_selection", "donate_input"))
def random_solarize(im, key, p=0.1, return_selection=False,
                    donate_input=False):
    """JAX/Pallas equivalent of RandomSolarize.forward.

    im: float array (B, C, H, W), values assumed in [0, 1].
    key: jax PRNG key (replaces torch.rand's implicit global RNG).
    """
    B, C, H, W = im.shape
    chw = C * H * W

    # Per-batch Bernoulli selection (computed in f32 so p is not quantized).
    rand = jax.random.uniform(key, (B,), dtype=jnp.float32)
    sel = rand < jnp.float32(p)
    sel_col = sel.astype(jnp.int32).reshape(B, 1)

    # Free reshape for contiguous NCHW: every grid column block holds the same
    # column range of all B batch rows.
    x2 = im.reshape(B, chw)

    itemsize = jnp.dtype(im.dtype).itemsize
    block_cols = _choose_block_cols(B, chw, itemsize)
    n_blocks = -(-chw // block_cols)   # final block may be partial -> masked store

    out2 = pl.pallas_call(
        _solarize_kernel,
        out_shape=jax.ShapeDtypeStruct((B, chw), im.dtype),
        grid=(n_blocks,),
        in_specs=[
            pl.BlockSpec((B, 1), lambda j: (0, 0)),            # selection flags
            pl.BlockSpec((B, block_cols), lambda j: (0, j)),   # image tile
        ],
        out_specs=pl.BlockSpec((B, block_cols), lambda j: (0, j)),
        compiler_params=pltpu.CompilerParams(
            dimension_semantics=("parallel",),
            vmem_limit_bytes=_VMEM_LIMIT_BYTES,
        ),
        # Reuse im's HBM buffer for the output when the caller donates it
        # (caller must also donate `im` at its own jit boundary, otherwise XLA
        # inserts a defensive copy).
        input_output_aliases=({1: 0} if donate_input else {}),
    )(sel_col, x2)

    out = out2.reshape(B, C, H, W)

    if return_selection:
        return out, sel
    return out


def _reference(im, sel):
    sol = jnp.where(im < 0.5, im, 1.0 - im)
    return jnp.where(sel[:, None, None, None], sol, im)


if __name__ == "__main__":
    key = jax.random.PRNGKey(0)
    k_data, k_sel, k_data2, k_sel2 = jax.random.split(key, 4)

    # Main smoke test: shapes consistent with the module.
    B, C, H, W = 2, 4, 16, 16
    im = jax.random.uniform(k_data, (B, C, H, W), dtype=jnp.float32)
    # p=0.6 so the selection path is likely exercised.
    out, sel = random_solarize(im, k_sel, p=0.6, return_selection=True)
    out = jax.block_until_ready(out)
    sel = jax.block_until_ready(sel)
    assert out.shape == im.shape and out.dtype == im.dtype
    assert jnp.allclose(out, _reference(im, sel), atol=1e-6), "mismatch (main)"

    # Secondary check: C*H*W not a multiple of 128 (previously the pad path;
    # now handled with zero extra copies).
    im2 = jax.random.uniform(k_data2, (2, 3, 7, 9), dtype=jnp.float32)
    out2, sel2 = random_solarize(im2, k_sel2, p=0.6, return_selection=True)
    out2 = jax.block_until_ready(out2)
    sel2 = jax.block_until_ready(sel2)
    assert jnp.allclose(out2, _reference(im2, sel2), atol=1e-6), "mismatch (odd shape)"

    print("KERNEL_OK")
</pallas_src>

<mosaic_0001>
module attributes {stable_mosaic.version = 11 : i64} {
  func.func @_solarize_kernel(%arg0: i32, %arg1: memref<2x1xi32, #tpu.memory_space<vmem>>, %arg2: memref<2x1024xf32, #tpu.memory_space<vmem>>, %arg3: memref<2x1024xf32, #tpu.memory_space<vmem>>) attributes {dimension_semantics = [#tpu.dimension_semantics<parallel>], iteration_bounds = array<i64: 1>, scalar_prefetch = 0 : i64, scratch_operands = 0 : i64, tpu.core_type = #tpu.core_type<tc>, window_params = [{pipeline_mode = #tpu.pipeline_mode<synchronous>, transform_indices = @transform_0, window_bounds = array<i64: 2, 1>}, {transform_indices = @transform_1, window_bounds = array<i64: 2, 1024>}, {transform_indices = @transform_2, window_bounds = array<i64: 2, 1024>}]} {
    %c0 = arith.constant 0 : index
    %c0_0 = arith.constant 0 : index
    %0 = vector.load %arg2[%c0, %c0_0] : memref<2x1024xf32, #tpu.memory_space<vmem>>, vector<2x1024xf32>
    %cst = arith.constant 5.000000e-01 : f32
    %1 = vector.broadcast %cst : f32 to vector<2x1024xf32>
    %2 = arith.cmpf olt, %0, %1 : vector<2x1024xf32>
    %cst_1 = arith.constant 1.000000e+00 : f32
    %3 = vector.broadcast %cst_1 : f32 to vector<2x1024xf32>
    %4 = arith.subf %3, %0 : vector<2x1024xf32>
    %5 = arith.select %2, %0, %4 : vector<2x1024xi1>, vector<2x1024xf32>
    %c0_2 = arith.constant 0 : index
    %c0_3 = arith.constant 0 : index
    %6 = vector.load %arg1[%c0_2, %c0_3] : memref<2x1xi32, #tpu.memory_space<vmem>>, vector<2x1xi32>
    %c0_i32 = arith.constant 0 : i32
    %7 = vector.broadcast %c0_i32 : i32 to vector<2x1xi32>
    %8 = arith.cmpi ne, %6, %7 : vector<2x1xi32>
    %9 = vector.shape_cast %8 : vector<2x1xi1> to vector<2x1xi1>
    %10 = vector.broadcast %9 : vector<2x1xi1> to vector<2x1024xi1>
    %11 = arith.select %10, %5, %0 : vector<2x1024xi1>, vector<2x1024xf32>
    %c0_4 = arith.constant 0 : index
    %c0_5 = arith.constant 0 : index
    %12 = vector.load %arg3[%c0_4, %c0_5] : memref<2x1024xf32, #tpu.memory_space<vmem>>, vector<2x1024xf32>
    tpu.vector_store %arg3[%c0_4, %c0_5], %11 {strides = array<i32>} : memref<2x1024xf32, #tpu.memory_space<vmem>>, vector<2x1024xf32>,
    return
  }
  func.func @transform_0(%arg0: i32) -> (i32, i32) {
    %c0_i32 = arith.constant 0 : i32
    %c0_i32_0 = arith.constant 0 : i32
    %c0_i32_1 = arith.constant 0 : i32
    return %c0_i32, %c0_i32_0 : i32, i32
  }
  func.func @transform_1(%arg0: i32) -> (i32, i32) {
    %c0_i32 = arith.constant 0 : i32
    %c0_i32_0 = arith.constant 0 : i32
    return %c0_i32, %arg0 : i32, i32
  }
  func.func @transform_2(%arg0: i32) -> (i32, i32) {
    %c0_i32 = arith.constant 0 : i32
    %c0_i32_0 = arith.constant 0 : i32
    return %c0_i32, %arg0 : i32, i32
  }
}

</mosaic_0001>

<bundles_post_ra>
// kernel: random_solarize.1
= control target key start
LH: loop header
LB: loop body
LE: loop exit
PB: predicated region body
PF: predicated region fallthrough
CT: control target
= control target key end

     0   :  { %v177_v0 = vmov 0   ;;  %v178_v5 = vmov 1983009808   ;;  %v32_v7 = vlaneseq  ;;  %s209_s0 = inlined_call_operand.vmem [shape: s32[2,1], index: 0, kind: input, shape index: {}]   ;;  %s210_s1 = inlined_call_operand.vmem [shape: f32[2,1024], index: 1, kind: input, shape index: {}]   ;;  %s211_s2 = inlined_call_operand.vmem [shape: f32[2,1024], index: 2, kind: output, shape index: {}]  }
   0x1   :  { %174 = vset.pattern.permute.xlu0 %v177_v0  ;;  %v19_v1 = vld [vmem:[%s209_s0] sm:$0x3]  ;;  %v12_v4 = vld [vmem:[%s210_s1 + $0x8] sm:$0xff]  ;;  %v30_v6 = vunpack.c.l.s4 %v178_v5 }
   0x2   :  { %vm20_vm0 = vcmp.ne.s32.totalorder %v19_v1, 0  ;;  %v11_v3 = vld [vmem:[%s210_s1] sm:$0xff]  ;;  %v16_v9 = vsub.f32 1.0, %v12_v4  ;;  %vm14_vm2 = vcmp.lt.f32.partialorder %v12_v4, 0.5  ;;  %v33_v11 = vshrl.u32 %v32_v7, 7 }
   0x3   :  { %v21_v2 = vsel %vm20_vm0, 1, %v177_v0  ;;  %v15_v8 = vsub.f32 1.0, %v11_v3  ;;  %vm13_vm1 = vcmp.lt.f32.partialorder %v11_v3, 0.5  ;;  %v31_v10 = vunpack.c.0.s8 %v30_v6 }
   0x4   :  { %23 = vperm.xlu0 %174, %v21_v2   ;;  %v18_v13 = vsel %vm14_vm2, %v12_v4, %v16_v9  ;;  %v72_v16 = vcombine.high %v11_v3, %v11_v3  ;;  %v89_v18 = vcombine.high %v12_v4, %v12_v4 }
   0x5   :  { %v17_v12 = vsel %vm13_vm1, %v11_v3, %v15_v8  ;;  %v34_v15 = vsub.s32 %v31_v10, %v33_v11  ;;  %v45_v17 = vcombine.high %v18_v13, %v18_v13 }
   0x6   :  { %v28_v14 = vcombine.high %v17_v12, %v17_v12 }
   0x7   :  { %v35_v19 = vrot.slane %v17_v12, %v34_v15  ;;  %v79_v21 = vrot.slane %v11_v3, %v34_v15  ;;  %v86_v22 = vrot.slane %v72_v16, %v34_v15  ;;  %v52_v23 = vrot.slane %v18_v13, %v34_v15 }
   0x8   :  { %v42_v20 = vrot.slane %v28_v14, %v34_v15  ;;  %v59_v24 = vrot.slane %v45_v17, %v34_v15  ;;  %v96_v25 = vrot.slane %v12_v4, %v34_v15  ;;  %v103_v26 = vrot.slane %v89_v18, %v34_v15 }
   0x9   :  { %v43_v27 = vcombine.high %v35_v19, %v35_v19  ;;  %v87_v29 = vcombine.high %v79_v21, %v79_v21  ;;  %v88_v30 = vcombine.high %v86_v22, %v86_v22  ;;  %v60_v31 = vcombine.high %v52_v23, %v52_v23 }
   0xa   :  { %v44_v28 = vcombine.high %v42_v20, %v42_v20  ;;  %v61_v32 = vcombine.high %v59_v24, %v59_v24  ;;  %v104_v33 = vcombine.high %v96_v25, %v96_v25  ;;  %v105_v34 = vcombine.high %v103_v26, %v103_v26 }
  0x83   :  { %v24_v35 = vpop.permute.xlu0 %23 }
  0x84   :  { %vm25_vm3 = vcmp.eq.s32.totalorder %v24_v35, 1 }
  0x85   :  { %v114_v36 = vsel %vm25_vm3, %v35_v19, %v79_v21  ;;  %v115_v37 = vsel %vm25_vm3, %v43_v27, %v87_v29  ;;  %v116_v38 = vsel %vm25_vm3, %v42_v20, %v86_v22  ;;  %v117_v39 = vsel %vm25_vm3, %v44_v28, %v88_v30 }
  0x86   :  { %v118_v40 = vsel %vm25_vm3, %v52_v23, %v96_v25  ;;  %v119_v41 = vsel %vm25_vm3, %v60_v31, %v104_v33  ;;  %v120_v42 = vsel %vm25_vm3, %v59_v24, %v103_v26  ;;  %v121_v43 = vsel %vm25_vm3, %v61_v32, %v105_v34 }
  0x87   :  { %v130_v44 = vcombine.low %v114_v36, %v115_v37  ;;  %v131_v45 = vcombine.low %v116_v38, %v117_v39  ;;  %v147_v46 = vcombine.low %v118_v40, %v119_v41  ;;  %v148_v47 = vcombine.low %v120_v42, %v121_v43 }
  0x89   :  { %v138_v48 = vrot.slane %v130_v44, %v34_v15  ;;  %v145_v49 = vrot.slane %v131_v45, %v34_v15  ;;  %v155_v50 = vrot.slane %v147_v46, %v34_v15  ;;  %v162_v51 = vrot.slane %v148_v47, %v34_v15 }
  0x8b   :  { %v146_v52 = vcombine.low %v138_v48, %v145_v49  ;;  %v163_v53 = vcombine.low %v155_v50, %v162_v51 }
  0x8d   :  { %166 = vst [vmem:[%s211_s2] sm:$0xff] %v146_v52  ;;  %167 = vst [vmem:[%s211_s2 + $0x8] sm:$0xff] %v163_v53 }

</bundles_post_ra>
